<compile_context>
chip_gen: v6e
topology: v6e:2x2x1
jax: 0.10.0
libtpu: 0.0.40
codegen_flags: <defaults>
</compile_context>

<pallas_src>
import math

import jax
import jax.numpy as jnp
from jax import lax
from jax.experimental import pallas as pl
from jax.experimental.pallas import tpu as pltpu


_EPS = 1e-12  # matches F.normalize default (clamp on the norm)


def cosine_classifier_kernel(sigma_ref, x_ref, wn_ref, o_ref):
    """One (tm, tn) output tile: f32 row-normalize x (sigma folded in), then a
    bf16 MXU matmul against the pre-normalized weight tile, f32 accumulation."""
    x = x_ref[...].astype(jnp.float32)                       # (tm, D)
    sumsq = jnp.sum(x * x, axis=1, keepdims=True)            # (tm, 1)
    # 1 / max(||x||, eps) == rsqrt(max(sumsq, eps^2)); rsqrt goes to the EUP.
    inv = lax.rsqrt(jnp.maximum(sumsq, _EPS * _EPS))
    xn = (x * (inv * sigma_ref[0])).astype(jnp.bfloat16)     # sigma folded in

    # (tm, D) x (tn, D) contracted over D -> (tm, tn) f32 on the MXU.
    o_ref[...] = lax.dot_general(
        xn, wn_ref[...],
        dimension_numbers=(((1,), (1,)), ((), ())),
        preferred_element_type=jnp.float32,
    )


def _round_up(x, m):
    return ((x + m - 1) // m) * m


def _choose_tiles(B, C, D, budget_bytes=24 << 20):
    """Pick (tm, tn): MXU-friendly (<=256), lane-dense tn (multiple of 128),
    and small enough that double-buffered f32-x + bf16-w + f32-out tiles fit
    under the default scoped VMEM limit on all TPU generations (incl. v7x)."""
    tm = 256 if B > 256 else _round_up(max(B, 1), 8)
    tn = 256 if C > 256 else 128

    def est(tm_, tn_):
        return 2 * (tm_ * D * 4 + tn_ * D * 2 + tm_ * tn_ * 4)

    while est(tm, tn) > budget_bytes:
        if tm > 8:
            tm = _round_up(max(8, tm // 2), 8)
        elif tn > 128:
            tn //= 2
        else:
            break
    return tm, tn


def prepare_classifier_weights(task_weights, eps=_EPS):
    """Stack the per-task weights once and row-L2-normalize them (plain XLA).

    Only needs to run when the parameters change (optimizer step / task add),
    not per forward call, so it is hoisted out of the per-tile kernel path.
    Returns a (C_total, in_features) bfloat16 matrix of unit rows.
    """
    w = jnp.concatenate([jnp.asarray(t, jnp.float32) for t in task_weights],
                        axis=0)
    sumsq = jnp.sum(w * w, axis=1, keepdims=True)
    wn = w * lax.rsqrt(jnp.maximum(sumsq, eps * eps))
    return wn.astype(jnp.bfloat16)


def custom_classifier_forward(x, wn_bf16, sigma):
    """Forward pass of CustomClassifier.

    x:        (B, in_features) float32 non-normalized features
    wn_bf16:  (C_total, in_features) bfloat16, rows already L2-normalized
              (from prepare_classifier_weights)
    sigma:    (1,) float32 scale parameter
    returns:  (B, C_total) float32 logits
    """
    x = jnp.asarray(x, jnp.float32)
    B, D = x.shape
    C = wn_bf16.shape[0]

    tm, tn = _choose_tiles(B, C, D)
    B_pad = _round_up(B, tm)
    C_pad = _round_up(C, tn)

    if B_pad != B:                       # zero rows normalize to zero -> safe
        x = jnp.pad(x, ((0, B_pad - B), (0, 0)))
    if C_pad != C:                       # zero weight rows -> zero logits
        wn_bf16 = jnp.pad(wn_bf16, ((0, C_pad - C), (0, 0)))

    grid = (B_pad // tm, C_pad // tn)

    out = pl.pallas_call(
        cosine_classifier_kernel,
        out_shape=jax.ShapeDtypeStruct((B_pad, C_pad), jnp.float32),
        grid=grid,
        in_specs=[
            pl.BlockSpec(memory_space=pltpu.SMEM),               # sigma (1,)
            pl.BlockSpec((tm, D), lambda i, j: (i, 0)),           # x batch tile
            pl.BlockSpec((tn, D), lambda i, j: (j, 0)),           # W class tile
        ],
        out_specs=pl.BlockSpec((tm, tn), lambda i, j: (i, j)),
        compiler_params=pltpu.CompilerParams(
            dimension_semantics=("parallel", "parallel"),
        ),
        cost_estimate=pl.CostEstimate(
            flops=2 * B_pad * C_pad * D,
            transcendentals=B_pad,
            bytes_accessed=4 * B_pad * D + 2 * C_pad * D + 4 * B_pad * C_pad,
        ),
    )(sigma, x, wn_bf16)

    return out[:B, :C]


def init_params(key, in_features, class_per_task, n_tasks):
    """Deterministic re-implementation of CustomClassifier.reset_parameters."""
    stdv = 1.0 / math.sqrt(in_features)
    keys = jax.random.split(key, n_tasks)
    weights = [
        jax.random.uniform(
            keys[t], (class_per_task, in_features),
            minval=-stdv, maxval=stdv, dtype=jnp.float32)
        for t in range(n_tasks)
    ]
    sigma = jnp.ones((1,), dtype=jnp.float32)
    return weights, sigma


if __name__ == "__main__":
    B = 8
    in_features = 32
    class_per_task = 4
    n_tasks = 2

    key = jax.random.PRNGKey(0)
    k_x, k_w = jax.random.split(key)

    x = jax.random.normal(k_x, (B, in_features), dtype=jnp.float32)
    weights, sigma = init_params(k_w, in_features, class_per_task, n_tasks)

    # Stack + normalize the classifier weights once (parameter-update-time
    # work, not per-forward work).
    wn = prepare_classifier_weights(weights)

    out = custom_classifier_forward(x, wn, sigma)
    out = jax.block_until_ready(out)

    # Pure-JAX f32 reference mirroring the PyTorch module.
    def ref(x, weights, sigma):
        eps = 1e-12
        xn = x / jnp.maximum(jnp.linalg.norm(x, axis=1, keepdims=True), eps)
        outs = []
        for w in weights:
            w_n = w / jnp.maximum(
                jnp.linalg.norm(w, axis=1, keepdims=True), eps)
            outs.append(xn @ w_n.T)
        return jnp.concatenate(outs, axis=1) * sigma[0]

    expected = ref(x, weights, sigma)
    assert out.shape == (B, n_tasks * class_per_task), out.shape
    # bf16 MXU operands with f32 accumulation -> relaxed tolerance vs f32 ref.
    max_err = float(jnp.max(jnp.abs(out - expected)))
    assert jnp.allclose(out, expected, atol=2e-2, rtol=2e-2), max_err

    print("KERNEL_OK")
</pallas_src>

<mosaic_0001>
module attributes {stable_mosaic.version = 11 : i64} {
  func.func @cosine_classifier_kernel(%arg0: i32, %arg1: i32, %arg2: memref<1xf32, #tpu.memory_space<smem>>, %arg3: memref<8x32xf32, #tpu.memory_space<vmem>>, %arg4: memref<128x32xbf16, #tpu.memory_space<vmem>>, %arg5: memref<8x128xf32, #tpu.memory_space<vmem>>) attributes {dimension_semantics = [#tpu.dimension_semantics<parallel>, #tpu.dimension_semantics<parallel>], iteration_bounds = array<i64: 1, 1>, scalar_prefetch = 0 : i64, scratch_operands = 0 : i64, tpu.core_type = #tpu.core_type<tc>, window_params = [{transform_indices = @transform_0, window_bounds = array<i64: 1>}, {transform_indices = @transform_1, window_bounds = array<i64: 8, 32>}, {transform_indices = @transform_2, window_bounds = array<i64: 128, 32>}, {transform_indices = @transform_3, window_bounds = array<i64: 8, 128>}]} {
    %c0 = arith.constant 0 : index
    %c0_0 = arith.constant 0 : index
    %0 = vector.load %arg3[%c0, %c0_0] : memref<8x32xf32, #tpu.memory_space<vmem>>, vector<8x32xf32>
    %1 = arith.mulf %0, %0 : vector<8x32xf32>
    %cst = arith.constant dense<0.000000e+00> : vector<8xf32>
    %2 = vector.multi_reduction <add>, %1, %cst [1] : vector<8x32xf32> to vector<8xf32>
    %3 = vector.shape_cast %2 : vector<8xf32> to vector<8x1xf32>
    %cst_1 = arith.constant 1.000000e-24 : f32
    %4 = vector.broadcast %cst_1 : f32 to vector<8x1xf32>
    %5 = arith.maximumf %3, %4 : vector<8x1xf32>
    %6 = math.rsqrt %5 : vector<8x1xf32>
    %c0_2 = arith.constant 0 : index
    %7 = memref.load %arg2[%c0_2] : memref<1xf32, #tpu.memory_space<smem>>
    %8 = vector.broadcast %7 : f32 to vector<8x1xf32>
    %9 = arith.mulf %6, %8 : vector<8x1xf32>
    %10 = vector.broadcast %9 : vector<8x1xf32> to vector<8x32xf32>
    %11 = arith.mulf %0, %10 : vector<8x32xf32>
    %12 = arith.truncf %11 : vector<8x32xf32> to vector<8x32xbf16>
    %c0_3 = arith.constant 0 : index
    %c0_4 = arith.constant 0 : index
    %13 = vector.load %arg4[%c0_3, %c0_4] : memref<128x32xbf16, #tpu.memory_space<vmem>>, vector<128x32xbf16>
    %cst_5 = arith.constant dense<0.000000e+00> : vector<8x128xf32>
    %14 = tpu.matmul %12, %13, %cst_5 {dimension_numbers = #tpu.dot_dimension_numbers<[1], [1], [0], [0], [0, 0, 1, 0], [], []>} : vector<8x32xbf16>, vector<128x32xbf16>, vector<8x128xf32> -> vector<8x128xf32>
    %c0_6 = arith.constant 0 : index
    %c0_7 = arith.constant 0 : index
    %15 = vector.load %arg5[%c0_6, %c0_7] : memref<8x128xf32, #tpu.memory_space<vmem>>, vector<8x128xf32>
    tpu.vector_store %arg5[%c0_6, %c0_7], %14 {strides = array<i32>} : memref<8x128xf32, #tpu.memory_space<vmem>>, vector<8x128xf32>,
    return
  }
  func.func @transform_0(%arg0: i32, %arg1: i32) -> i32 {
    %c0_i32 = arith.constant 0 : i32
    %c0_i32_0 = arith.constant 0 : i32
    return %c0_i32 : i32
  }
  func.func @transform_1(%arg0: i32, %arg1: i32) -> (i32, i32) {
    %c0_i32 = arith.constant 0 : i32
    %c0_i32_0 = arith.constant 0 : i32
    return %arg0, %c0_i32 : i32, i32
  }
  func.func @transform_2(%arg0: i32, %arg1: i32) -> (i32, i32) {
    %c0_i32 = arith.constant 0 : i32
    %c0_i32_0 = arith.constant 0 : i32
    return %arg1, %c0_i32 : i32, i32
  }
  func.func @transform_3(%arg0: i32, %arg1: i32) -> (i32, i32) {
    %c0_i32 = arith.constant 0 : i32
    return %arg0, %arg1 : i32, i32
  }
}

</mosaic_0001>

<bundles_post_ra>
// kernel: tpu_custom_call.1
= control target key start
LH: loop header
LB: loop body
LE: loop exit
PB: predicated region body
PF: predicated region fallthrough
CT: control target
= control target key end

     0   :  { %vm19_vm0 = vcmask 261120   ;;  %v241_v3 = vmov 0.0   ;;  %s307_s0 = inlined_call_operand.<no memory space> [shape: f32[1], index: 0, kind: input, shape index: {}]   ;;  %s308_s1 = inlined_call_operand.vmem [shape: f32[8,32], index: 1, kind: input, shape index: {}]   ;;  %s309_s2 = inlined_call_operand.vmem [shape: bf16[128,32], index: 2, kind: input, shape index: {}]   ;;  %s310_s3 = inlined_call_operand.hbm [shape: f32[8,128], index: 3, kind: output, shape index: {}]  }
   0x1   :  { %v17_v0 = vld [vmem:[%s308_s1] sm:$0xff]  ;;  %v209_v1 = vld [vmem:[%s309_s2 + $0x38] sm:$0xff]   ;;  %186 = vmatprep.subr.bf16.mxu0 %v241_v3  ;;  %v210_v6 = vld [vmem:[%s309_s2 + $0x30] sm:$0xff]  }
   0x2   :  { %v18_v2 = vmul.f32 %v17_v0, %v17_v0  ;;  %v111_v4 = vsel %vm19_vm0, %v209_v1, 0  ;;  %v108_v7 = vsel %vm19_vm0, %v210_v6, 0 }
   0x3   :  { %187 = vmatpush3.bf16.xpose.msra.mxu0 %v111_v4 }
   0x4   :  { %v20_v5 = vsel %vm19_vm0, %v18_v2, 0.0  ;;  %188 = vmatprep.subr.bf16.mxu0 %v241_v3 }
   0x5   :  { %21 = vadd.xlane.f32.xlu0 %v20_v5 }
   0x6   :  { %9 = vsyncpa [#allocation4], 0  ;;  %v211_v8 = vld [vmem:[%s309_s2 + $0x28] sm:$0xff]   ;;  %vm242_vm1 = vmmov 0   ;;  %v212_v10 = vld [vmem:[%s309_s2 + $0x20] sm:$0xff]   ;;  %v26_v22 = vstv %s307_s0  ;;  %s243_s4 = smov [#allocation3]  }
   0x7   :  { %v105_v9 = vsel %vm19_vm0, %v211_v8, 0  ;;  %202 = vmatprep.mubr.msk.bf16.mxu0 %vm242_vm1, %v241_v3  ;;  %v102_v11 = vsel %vm19_vm0, %v212_v10, 0  ;;  %v213_v12 = vld [vmem:[%s309_s2 + $0x18] sm:$0xff]   ;;  %v214_v14 = vld [vmem:[%s309_s2 + $0x10] sm:$0xff]   ;;  %v215_v16 = vld [vmem:[%s309_s2 + $0x8] sm:$0xff]   ;;  %s160_s5 = sshll.u32 %s243_s4, 4  ;;  %s161_s5 = int_to_ptr.vmem [resolvable:$true] %s160_s5 }
   0x8   :  { %v99_v13 = vsel %vm19_vm0, %v213_v12, 0  ;;  %v96_v15 = vsel %vm19_vm0, %v214_v14, 0  ;;  %v93_v17 = vsel %vm19_vm0, %v215_v16, 0  ;;  %v216_v18 = vld [vmem:[%s309_s2] sm:$0xff]   ;;  %s219_s2 = scalar_lea.vmem %s161_s5, 128  ;;  %p224_p1 = scmp.lt.s32.totalorder %s161_s5, %s161_s5 }
   0x9   :  { %v90_v19 = vsel %vm19_vm0, %v216_v18, 0  ;;  %p220_p0 = scmp.ne.s32.totalorder %s161_s5, %s219_s2  ;;  %p225_p2 = scmp.lt.s32.totalorder %s219_s2, %s219_s2 }
   0xb   :  { %189 = vmatpush3.bf16.xpose.msra.mxu0 %v108_v7  ;;  %p226_p3 = por %p225_p2, %p224_p1 }
   0xc   :  { %190 = vmatprep.subr.bf16.mxu0 %v241_v3 }
   0xd   :  { %p227_p4 = pnand %p226_p3, %p220_p0 }
  0x13   :  { %191 = vmatpush3.bf16.xpose.msra.mxu0 %v105_v9 }
  0x14   :  { %192 = vmatprep.subr.bf16.mxu0 %v241_v3 }
  0x1b   :  { %193 = vmatpush3.bf16.xpose.msra.mxu0 %v102_v11 }
  0x1c   :  { %194 = vmatprep.subr.bf16.mxu0 %v241_v3 }
  0x23   :  { %195 = vmatpush3.bf16.xpose.msra.mxu0 %v99_v13 }
  0x24   :  { %196 = vmatprep.subr.bf16.mxu0 %v241_v3 }
  0x2b   :  { %197 = vmatpush3.bf16.xpose.msra.mxu0 %v96_v15 }
  0x2c   :  { %198 = vmatprep.subr.bf16.mxu0 %v241_v3 }
  0x33   :  { %199 = vmatpush3.bf16.xpose.msra.mxu0 %v93_v17 }
  0x34   :  { %200 = vmatprep.subr.bf16.mxu0 %v241_v3 }
  0x3b   :  { %201 = vmatpush3.bf16.xpose.msra.mxu0 %v90_v19 }
  0x8e   :  { %v22_v20 = vpop.xlane.xlu0 %21 }
  0x8f   :  { %v23_v21 = vmax.f32 %v22_v20, 1e-24 }
  0x91   :  { %217 = vrsqrt.f32 %v23_v21 }
  0x9e   :  { %v218_v23 = vpop.eup %217 }
  0x9f   :  { %v27_v24 = vmul.f32 %v218_v23, %v26_v22 }
  0xa1   :  { %v28_v25 = vmul.f32 %v27_v24, %v17_v0 }
  0xa3   :  { %v29_v26 = vpack.c.bf16 %v28_v25, %v28_v25 }
  0xa5   :  { %203 = vmatmul.mubr.msk.bf16.vlgmr.msra.gmra.mxu0 %vm19_vm0, %v29_v26 }
 0x165   :  { %v147_v27 = vpop.f32.mrf.mxu0 }
 0x166   :  { %153 = vst [vmem:[#allocation3] sm:$0xff] %v147_v27 }
 0x167   :  { %v204_v28 = vpop.f32.mrf.mxu0 }
 0x168   :  { %230 = shalt.err (!%p227_p4)
}
 0x169   :  { %163 = dma.vmem_to_hbm [thread:$0]  %s161_s5, 128, %s310_s3, [#allocation4]   ;;  %v150_v29 = vpop.f32.mrf.mxu0 }
 0x16b   :  { %v205_v30 = vpop.f32.mrf.mxu0 }
 0x16c   :  { %239 = dma.done.wait [#allocation4], 128  }
 0x16d   :  { %240 = vsyncadd [#allocation4], 4294967168 }
 0x16e   :  { %167 = vsyncpa [#allocation4], 1 }

</bundles_post_ra>
